<compile_context>
chip_gen: v7x
topology: tpu7x:2x2x1
jax: 0.10.0
libtpu: 0.0.40
codegen_flags: <defaults>
</compile_context>

<pallas_src>
import jax
import jax.numpy as jnp
from jax.experimental import pallas as pl
from jax.experimental.pallas import tpu as pltpu


def add_kernel(a_ref, b_ref, o_ref):
    # Single whole-array VMEM tile; plain VPU elementwise add.
    o_ref[...] = a_ref[...] + b_ref[...]


def pallas_add(x103, x88):
    assert x103.shape == x88.shape and x103.dtype == x88.dtype
    nelems = x103.size
    itemsize = jnp.dtype(x103.dtype).itemsize

    # Tiny advisory cost hint: 1 add/elem, 2 reads + 1 write per elem.
    cost = pl.CostEstimate(
        flops=nelems,
        transcendentals=0,
        bytes_accessed=3 * nelems * itemsize,
    )

    return pl.pallas_call(
        add_kernel,
        out_shape=jax.ShapeDtypeStruct(x103.shape, x103.dtype),
        # Whole-array, unblocked operands resident in VMEM: no grid, no
        # double-buffered pipeline machinery, no per-step grid overhead, and
        # no reshape/relayout kernels around the custom call.
        in_specs=[
            pl.BlockSpec(memory_space=pltpu.MemorySpace.VMEM),
            pl.BlockSpec(memory_space=pltpu.MemorySpace.VMEM),
        ],
        out_specs=pl.BlockSpec(memory_space=pltpu.MemorySpace.VMEM),
        # Let the output reuse x103's HBM buffer (residual input is dead
        # afterwards in the original graph).
        input_output_aliases={0: 0},
        cost_estimate=cost,
    )(x103, x88)


if __name__ == "__main__":
    key = jax.random.PRNGKey(0)
    k1, k2 = jax.random.split(key)
    # Shapes consistent with the module's forward: [1, 80, 14, 14]
    x103 = jax.random.normal(k1, (1, 80, 14, 14), dtype=jnp.float32)
    x88 = jax.random.normal(k2, (1, 80, 14, 14), dtype=jnp.float32)

    # Reference computed first (value semantics hold regardless, since the
    # inputs are not donated at any jit boundary).
    ref = x103 + x88

    out = pallas_add(x103, x88)
    jax.block_until_ready(out)

    assert out.shape == (1, 80, 14, 14)
    assert out.dtype == x103.dtype
    assert jnp.allclose(out, ref, atol=1e-6, rtol=1e-6)

    print("KERNEL_OK")
</pallas_src>

<mosaic_0001>
module attributes {stable_mosaic.version = 11 : i64} {
  func.func @add_kernel(%arg0: memref<1x80x14x14xf32, #tpu.memory_space<vmem>>, %arg1: memref<1x80x14x14xf32, #tpu.memory_space<vmem>>, %arg2: memref<1x80x14x14xf32, #tpu.memory_space<vmem>>) attributes {dimension_semantics = [], scalar_prefetch = 0 : i64, scratch_operands = 0 : i64, tpu.core_type = #tpu.core_type<tc>} {
    %c0 = arith.constant 0 : index
    %c0_0 = arith.constant 0 : index
    %c0_1 = arith.constant 0 : index
    %c0_2 = arith.constant 0 : index
    %0 = vector.load %arg0[%c0, %c0_0, %c0_1, %c0_2] : memref<1x80x14x14xf32, #tpu.memory_space<vmem>>, vector<1x80x14x14xf32>
    %c0_3 = arith.constant 0 : index
    %c0_4 = arith.constant 0 : index
    %c0_5 = arith.constant 0 : index
    %c0_6 = arith.constant 0 : index
    %1 = vector.load %arg1[%c0_3, %c0_4, %c0_5, %c0_6] : memref<1x80x14x14xf32, #tpu.memory_space<vmem>>, vector<1x80x14x14xf32>
    %2 = arith.addf %0, %1 : vector<1x80x14x14xf32>
    %c0_7 = arith.constant 0 : index
    %c0_8 = arith.constant 0 : index
    %c0_9 = arith.constant 0 : index
    %c0_10 = arith.constant 0 : index
    %3 = vector.load %arg2[%c0_7, %c0_8, %c0_9, %c0_10] : memref<1x80x14x14xf32, #tpu.memory_space<vmem>>, vector<1x80x14x14xf32>
    tpu.vector_store %arg2[%c0_7, %c0_8, %c0_9, %c0_10], %2 {strides = array<i32>} : memref<1x80x14x14xf32, #tpu.memory_space<vmem>>, vector<1x80x14x14xf32>,
    return
  }
}

</mosaic_0001>

<bundles_post_ra>
// kernel: tpu_custom_call.1
= control target key start
LH: loop header
LB: loop body
LE: loop exit
PB: predicated region body
PF: predicated region fallthrough
CT: control target
= control target key end

     0   :  { %vm491_vm0 = vcmask 113664   ;;  %vm493_vm1 = vcmask 111616   ;;  %s2272_s0 = inlined_call_operand.vmem [shape: f32[1,80,14,14], index: 0, kind: input, shape index: {}, may-alias: {0,2}]   ;;  %s2273_s1 = inlined_call_operand.vmem [shape: f32[1,80,14,14], index: 1, kind: input, shape index: {}]   ;;  %s2274_s2 = inlined_call_operand.vmem [shape: f32[1,80,14,14], index: 2, kind: output, shape index: {}, may-alias: {0,2}]  }
   0x1   :  { %v11_v0 = vld [vmem:[%s2272_s0] sm:$0xff]  ;;  %v12_v2 = vld [vmem:[%s2272_s0 + $0x8] sm:$0x3f]  ;;  %v13_v5 = vld [vmem:[%s2272_s0 + $0x10] sm:$0xff] }
   0x2   :  { %v171_v1 = vld [vmem:[%s2273_s1] sm:$0xff]  ;;  %v172_v4 = vld [vmem:[%s2273_s1 + $0x8] sm:$0x3f]  ;;  %v173_v6 = vld [vmem:[%s2273_s1 + $0x10] sm:$0xff] }
   0x3   :  { %v331_v3 = vadd.f32 %v171_v1, %v11_v0  ;;  %v332_v7 = vadd.f32 %v172_v4, %v12_v2  ;;  %v333_v8 = vadd.f32 %v173_v6, %v13_v5  ;;  %v14_v9 = vld [vmem:[%s2272_s0 + $0x18] sm:$0x3f]  ;;  %v15_v11 = vld [vmem:[%s2272_s0 + $0x20] sm:$0xff]  ;;  %v176_v15 = vld [vmem:[%s2273_s1 + $0x28] sm:$0x3f] }
   0x4   :  { %v174_v10 = vld [vmem:[%s2273_s1 + $0x18] sm:$0x3f]  ;;  %v175_v13 = vld [vmem:[%s2273_s1 + $0x20] sm:$0xff]  ;;  %v177_v19 = vld [vmem:[%s2273_s1 + $0x30] sm:$0xff] }
   0x5   :  { %492 = vst.msk [vmem:[%s2274_s2] sm:$0xff] %vm491_vm0, %v331_v3  ;;  %v334_v12 = vadd.f32 %v174_v10, %v14_v9  ;;  %v335_v16 = vadd.f32 %v175_v13, %v15_v11  ;;  %v178_v22 = vld [vmem:[%s2273_s1 + $0x38] sm:$0x3f]  ;;  %v179_v24 = vld [vmem:[%s2273_s1 + $0x40] sm:$0xff]  ;;  %v180_v28 = vld [vmem:[%s2273_s1 + $0x48] sm:$0x3f] }
   0x6   :  { %v181_v31 = vld [vmem:[%s2273_s1 + $0x50] sm:$0xff]  ;;  %v182_v33 = vld [vmem:[%s2273_s1 + $0x58] sm:$0x3f]  ;;  %v183_v37 = vld [vmem:[%s2273_s1 + $0x60] sm:$0xff] }
   0x7   :  { %v184_v40 = vld [vmem:[%s2273_s1 + $0x68] sm:$0x3f]  ;;  %v185_v42 = vld [vmem:[%s2273_s1 + $0x70] sm:$0xff]  ;;  %v186_v46 = vld [vmem:[%s2273_s1 + $0x78] sm:$0x3f] }
   0x8   :  { %v187_v49 = vld [vmem:[%s2273_s1 + $0x80] sm:$0xff]  ;;  %v188_v51 = vld [vmem:[%s2273_s1 + $0x88] sm:$0x3f]  ;;  %v189_v55 = vld [vmem:[%s2273_s1 + $0x90] sm:$0xff] }
   0x9   :  { %v190_v58 = vld [vmem:[%s2273_s1 + $0x98] sm:$0x3f]  ;;  %v191_v60 = vld [vmem:[%s2273_s1 + $0xa0] sm:$0xff]  ;;  %v192_v0 = vld [vmem:[%s2273_s1 + $0xa8] sm:$0x3f] }
   0xa   :  { %v193_v3 = vld [vmem:[%s2273_s1 + $0xb0] sm:$0xff]  ;;  %v194_v5 = vld [vmem:[%s2273_s1 + $0xb8] sm:$0x3f]  ;;  %v195_v9 = vld [vmem:[%s2273_s1 + $0xc0] sm:$0xff] }
   0xc   :  { %v16_v14 = vld [vmem:[%s2272_s0 + $0x28] sm:$0x3f] }
   0xd   :  { %494 = vst.msk [vmem:[%s2274_s2 + $0x8] sm:$0x3f] %vm493_vm1, %v332_v7  ;;  %v336_v17 = vadd.f32 %v176_v15, %v16_v14  ;;  %v197_v14 = vld [vmem:[%s2273_s1 + $0xd0] sm:$0xff] }
   0xe   :  { %495 = vst.msk [vmem:[%s2274_s2 + $0x10] sm:$0xff] %vm491_vm0, %v333_v8 }
  0x15   :  { %v17_v18 = vld [vmem:[%s2272_s0 + $0x30] sm:$0xff]  ;;  %v18_v20 = vld [vmem:[%s2272_s0 + $0x38] sm:$0x3f] }
  0x16   :  { %496 = vst.msk [vmem:[%s2274_s2 + $0x18] sm:$0x3f] %vm493_vm1, %v334_v12  ;;  %v337_v21 = vadd.f32 %v177_v19, %v17_v18  ;;  %v338_v25 = vadd.f32 %v178_v22, %v18_v20  ;;  %v196_v12 = vld [vmem:[%s2273_s1 + $0xc8] sm:$0x3f]  ;;  %v198_v18 = vld [vmem:[%s2273_s1 + $0xd8] sm:$0x3f] }
  0x1d   :  { %v19_v23 = vld [vmem:[%s2272_s0 + $0x40] sm:$0xff] }
  0x1e   :  { %497 = vst.msk [vmem:[%s2274_s2 + $0x20] sm:$0xff] %vm491_vm0, %v335_v16  ;;  %v339_v26 = vadd.f32 %v179_v24, %v19_v23  ;;  %v200_v23 = vld [vmem:[%s2273_s1 + $0xe8] sm:$0x3f] }
  0x1f   :  { %498 = vst.msk [vmem:[%s2274_s2 + $0x28] sm:$0x3f] %vm493_vm1, %v336_v17 }
  0x26   :  { %v20_v27 = vld [vmem:[%s2272_s0 + $0x48] sm:$0x3f]  ;;  %v21_v29 = vld [vmem:[%s2272_s0 + $0x50] sm:$0xff] }
  0x27   :  { %499 = vst.msk [vmem:[%s2274_s2 + $0x30] sm:$0xff] %vm491_vm0, %v337_v21  ;;  %v340_v30 = vadd.f32 %v180_v28, %v20_v27  ;;  %v341_v34 = vadd.f32 %v181_v31, %v21_v29  ;;  %v199_v21 = vld [vmem:[%s2273_s1 + $0xe0] sm:$0xff]  ;;  %v201_v27 = vld [vmem:[%s2273_s1 + $0xf0] sm:$0xff] }
  0x2e   :  { %v22_v32 = vld [vmem:[%s2272_s0 + $0x58] sm:$0x3f] }
  0x2f   :  { %500 = vst.msk [vmem:[%s2274_s2 + $0x38] sm:$0x3f] %vm493_vm1, %v338_v25  ;;  %v342_v35 = vadd.f32 %v182_v33, %v22_v32  ;;  %v203_v32 = vld [vmem:[%s2273_s1 + $0x100] sm:$0xff] }
  0x30   :  { %501 = vst.msk [vmem:[%s2274_s2 + $0x40] sm:$0xff] %vm491_vm0, %v339_v26 }
  0x37   :  { %v23_v36 = vld [vmem:[%s2272_s0 + $0x60] sm:$0xff]  ;;  %v24_v38 = vld [vmem:[%s2272_s0 + $0x68] sm:$0x3f] }
  0x38   :  { %502 = vst.msk [vmem:[%s2274_s2 + $0x48] sm:$0x3f] %vm493_vm1, %v340_v30  ;;  %v343_v39 = vadd.f32 %v183_v37, %v23_v36  ;;  %v344_v43 = vadd.f32 %v184_v40, %v24_v38  ;;  %v202_v30 = vld [vmem:[%s2273_s1 + $0xf8] sm:$0x3f]  ;;  %v204_v36 = vld [vmem:[%s2273_s1 + $0x108] sm:$0x3f] }
  0x3f   :  { %v25_v41 = vld [vmem:[%s2272_s0 + $0x70] sm:$0xff] }
  0x40   :  { %503 = vst.msk [vmem:[%s2274_s2 + $0x50] sm:$0xff] %vm491_vm0, %v341_v34  ;;  %v345_v44 = vadd.f32 %v185_v42, %v25_v41  ;;  %v206_v41 = vld [vmem:[%s2273_s1 + $0x118] sm:$0x3f] }
  0x41   :  { %504 = vst.msk [vmem:[%s2274_s2 + $0x58] sm:$0x3f] %vm493_vm1, %v342_v35 }
  0x48   :  { %v26_v45 = vld [vmem:[%s2272_s0 + $0x78] sm:$0x3f]  ;;  %v27_v47 = vld [vmem:[%s2272_s0 + $0x80] sm:$0xff] }
  0x49   :  { %505 = vst.msk [vmem:[%s2274_s2 + $0x60] sm:$0xff] %vm491_vm0, %v343_v39  ;;  %v346_v48 = vadd.f32 %v186_v46, %v26_v45  ;;  %v347_v52 = vadd.f32 %v187_v49, %v27_v47  ;;  %v205_v39 = vld [vmem:[%s2273_s1 + $0x110] sm:$0xff]  ;;  %v207_v45 = vld [vmem:[%s2273_s1 + $0x120] sm:$0xff] }
  0x50   :  { %v28_v50 = vld [vmem:[%s2272_s0 + $0x88] sm:$0x3f] }
  0x51   :  { %506 = vst.msk [vmem:[%s2274_s2 + $0x68] sm:$0x3f] %vm493_vm1, %v344_v43  ;;  %v348_v53 = vadd.f32 %v188_v51, %v28_v50  ;;  %v209_v50 = vld [vmem:[%s2273_s1 + $0x130] sm:$0xff] }
  0x52   :  { %507 = vst.msk [vmem:[%s2274_s2 + $0x70] sm:$0xff] %vm491_vm0, %v345_v44 }
  0x59   :  { %v29_v54 = vld [vmem:[%s2272_s0 + $0x90] sm:$0xff]  ;;  %v30_v56 = vld [vmem:[%s2272_s0 + $0x98] sm:$0x3f] }
  0x5a   :  { %508 = vst.msk [vmem:[%s2274_s2 + $0x78] sm:$0x3f] %vm493_vm1, %v346_v48  ;;  %v349_v57 = vadd.f32 %v189_v55, %v29_v54  ;;  %v350_v61 = vadd.f32 %v190_v58, %v30_v56  ;;  %v208_v48 = vld [vmem:[%s2273_s1 + $0x128] sm:$0x3f]  ;;  %v210_v54 = vld [vmem:[%s2273_s1 + $0x138] sm:$0x3f] }
  0x61   :  { %v31_v59 = vld [vmem:[%s2272_s0 + $0xa0] sm:$0xff] }
  0x62   :  { %509 = vst.msk [vmem:[%s2274_s2 + $0x80] sm:$0xff] %vm491_vm0, %v347_v52  ;;  %v351_v62 = vadd.f32 %v191_v60, %v31_v59  ;;  %v212_v59 = vld [vmem:[%s2273_s1 + $0x148] sm:$0x3f] }
  0x63   :  { %510 = vst.msk [vmem:[%s2274_s2 + $0x88] sm:$0x3f] %vm493_vm1, %v348_v53 }
  0x6a   :  { %v32_v63 = vld [vmem:[%s2272_s0 + $0xa8] sm:$0x3f]  ;;  %v33_v1 = vld [vmem:[%s2272_s0 + $0xb0] sm:$0xff] }
  0x6b   :  { %511 = vst.msk [vmem:[%s2274_s2 + $0x90] sm:$0xff] %vm491_vm0, %v349_v57  ;;  %v352_v2 = vadd.f32 %v192_v0, %v32_v63  ;;  %v353_v6 = vadd.f32 %v193_v3, %v33_v1  ;;  %v211_v57 = vld [vmem:[%s2273_s1 + $0x140] sm:$0xff]  ;;  %v213_v63 = vld [vmem:[%s2273_s1 + $0x150] sm:$0xff] }
  0x72   :  { %v34_v4 = vld [vmem:[%s2272_s0 + $0xb8] sm:$0x3f] }
  0x73   :  { %512 = vst.msk [vmem:[%s2274_s2 + $0x98] sm:$0x3f] %vm493_vm1, %v350_v61  ;;  %v354_v7 = vadd.f32 %v194_v5, %v34_v4  ;;  %v215_v4 = vld [vmem:[%s2273_s1 + $0x160] sm:$0xff] }
  0x74   :  { %513 = vst.msk [vmem:[%s2274_s2 + $0xa0] sm:$0xff] %vm491_vm0, %v351_v62 }
  0x7b   :  { %v35_v8 = vld [vmem:[%s2272_s0 + $0xc0] sm:$0xff]  ;;  %v36_v10 = vld [vmem:[%s2272_s0 + $0xc8] sm:$0x3f] }
  0x7c   :  { %514 = vst.msk [vmem:[%s2274_s2 + $0xa8] sm:$0x3f] %vm493_vm1, %v352_v2  ;;  %v355_v11 = vadd.f32 %v195_v9, %v35_v8  ;;  %v356_v15 = vadd.f32 %v196_v12, %v36_v10  ;;  %v214_v2 = vld [vmem:[%s2273_s1 + $0x158] sm:$0x3f]  ;;  %v216_v8 = vld [vmem:[%s2273_s1 + $0x168] sm:$0x3f] }
  0x83   :  { %v37_v13 = vld [vmem:[%s2272_s0 + $0xd0] sm:$0xff] }
  0x84   :  { %515 = vst.msk [vmem:[%s2274_s2 + $0xb0] sm:$0xff] %vm491_vm0, %v353_v6  ;;  %v357_v16 = vadd.f32 %v197_v14, %v37_v13  ;;  %v218_v13 = vld [vmem:[%s2273_s1 + $0x178] sm:$0x3f] }
  0x85   :  { %516 = vst.msk [vmem:[%s2274_s2 + $0xb8] sm:$0x3f] %vm493_vm1, %v354_v7 }
  0x8c   :  { %v38_v17 = vld [vmem:[%s2272_s0 + $0xd8] sm:$0x3f]  ;;  %v39_v19 = vld [vmem:[%s2272_s0 + $0xe0] sm:$0xff] }
  0x8d   :  { %517 = vst.msk [vmem:[%s2274_s2 + $0xc0] sm:$0xff] %vm491_vm0, %v355_v11  ;;  %v358_v20 = vadd.f32 %v198_v18, %v38_v17  ;;  %v359_v24 = vadd.f32 %v199_v21, %v39_v19  ;;  %v217_v11 = vld [vmem:[%s2273_s1 + $0x170] sm:$0xff]  ;;  %v219_v17 = vld [vmem:[%s2273_s1 + $0x180] sm:$0xff] }
  0x94   :  { %v40_v22 = vld [vmem:[%s2272_s0 + $0xe8] sm:$0x3f] }
  0x95   :  { %518 = vst.msk [vmem:[%s2274_s2 + $0xc8] sm:$0x3f] %vm493_vm1, %v356_v15  ;;  %v360_v25 = vadd.f32 %v200_v23, %v40_v22  ;;  %v221_v22 = vld [vmem:[%s2273_s1 + $0x190] sm:$0xff] }
  0x96   :  { %519 = vst.msk [vmem:[%s2274_s2 + $0xd0] sm:$0xff] %vm491_vm0, %v357_v16 }
  0x9d   :  { %v41_v26 = vld [vmem:[%s2272_s0 + $0xf0] sm:$0xff]  ;;  %v42_v28 = vld [vmem:[%s2272_s0 + $0xf8] sm:$0x3f] }
  0x9e   :  { %520 = vst.msk [vmem:[%s2274_s2 + $0xd8] sm:$0x3f] %vm493_vm1, %v358_v20  ;;  %v361_v29 = vadd.f32 %v201_v27, %v41_v26  ;;  %v362_v33 = vadd.f32 %v202_v30, %v42_v28  ;;  %v220_v20 = vld [vmem:[%s2273_s1 + $0x188] sm:$0x3f]  ;;  %v222_v26 = vld [vmem:[%s2273_s1 + $0x198] sm:$0x3f] }
  0xa5   :  { %v43_v31 = vld [vmem:[%s2272_s0 + $0x100] sm:$0xff] }
  0xa6   :  { %521 = vst.msk [vmem:[%s2274_s2 + $0xe0] sm:$0xff] %vm491_vm0, %v359_v24  ;;  %v363_v34 = vadd.f32 %v203_v32, %v43_v31  ;;  %v224_v31 = vld [vmem:[%s2273_s1 + $0x1a8] sm:$0x3f] }
  0xa7   :  { %522 = vst.msk [vmem:[%s2274_s2 + $0xe8] sm:$0x3f] %vm493_vm1, %v360_v25 }
  0xae   :  { %v44_v35 = vld [vmem:[%s2272_s0 + $0x108] sm:$0x3f]  ;;  %v45_v37 = vld [vmem:[%s2272_s0 + $0x110] sm:$0xff] }
  0xaf   :  { %523 = vst.msk [vmem:[%s2274_s2 + $0xf0] sm:$0xff] %vm491_vm0, %v361_v29  ;;  %v364_v38 = vadd.f32 %v204_v36, %v44_v35  ;;  %v365_v42 = vadd.f32 %v205_v39, %v45_v37  ;;  %v223_v29 = vld [vmem:[%s2273_s1 + $0x1a0] sm:$0xff]  ;;  %v225_v35 = vld [vmem:[%s2273_s1 + $0x1b0] sm:$0xff] }
  0xb6   :  { %v46_v40 = vld [vmem:[%s2272_s0 + $0x118] sm:$0x3f] }
  0xb7   :  { %524 = vst.msk [vmem:[%s2274_s2 + $0xf8] sm:$0x3f] %vm493_vm1, %v362_v33  ;;  %v366_v43 = vadd.f32 %v206_v41, %v46_v40  ;;  %v227_v40 = vld [vmem:[%s2273_s1 + $0x1c0] sm:$0xff] }
  0xb8   :  { %525 = vst.msk [vmem:[%s2274_s2 + $0x100] sm:$0xff] %vm491_vm0, %v363_v34 }
  0xbf   :  { %v47_v44 = vld [vmem:[%s2272_s0 + $0x120] sm:$0xff]  ;;  %v48_v46 = vld [vmem:[%s2272_s0 + $0x128] sm:$0x3f] }
  0xc0   :  { %526 = vst.msk [vmem:[%s2274_s2 + $0x108] sm:$0x3f] %vm493_vm1, %v364_v38  ;;  %v367_v47 = vadd.f32 %v207_v45, %v47_v44  ;;  %v368_v51 = vadd.f32 %v208_v48, %v48_v46  ;;  %v226_v38 = vld [vmem:[%s2273_s1 + $0x1b8] sm:$0x3f]  ;;  %v228_v44 = vld [vmem:[%s2273_s1 + $0x1c8] sm:$0x3f] }
  0xc7   :  { %v49_v49 = vld [vmem:[%s2272_s0 + $0x130] sm:$0xff] }
  0xc8   :  { %527 = vst.msk [vmem:[%s2274_s2 + $0x110] sm:$0xff] %vm491_vm0, %v365_v42  ;;  %v369_v52 = vadd.f32 %v209_v50, %v49_v49  ;;  %v230_v49 = vld [vmem:[%s2273_s1 + $0x1d8] sm:$0x3f] }
  0xc9   :  { %528 = vst.msk [vmem:[%s2274_s2 + $0x118] sm:$0x3f] %vm493_vm1, %v366_v43 }
  0xd0   :  { %v50_v53 = vld [vmem:[%s2272_s0 + $0x138] sm:$0x3f]  ;;  %v51_v55 = vld [vmem:[%s2272_s0 + $0x140] sm:$0xff] }
  0xd1   :  { %529 = vst.msk [vmem:[%s2274_s2 + $0x120] sm:$0xff] %vm491_vm0, %v367_v47  ;;  %v370_v56 = vadd.f32 %v210_v54, %v50_v53  ;;  %v371_v60 = vadd.f32 %v211_v57, %v51_v55  ;;  %v229_v47 = vld [vmem:[%s2273_s1 + $0x1d0] sm:$0xff]  ;;  %v231_v53 = vld [vmem:[%s2273_s1 + $0x1e0] sm:$0xff] }
  0xd8   :  { %v52_v58 = vld [vmem:[%s2272_s0 + $0x148] sm:$0x3f] }
  0xd9   :  { %530 = vst.msk [vmem:[%s2274_s2 + $0x128] sm:$0x3f] %vm493_vm1, %v368_v51  ;;  %v372_v61 = vadd.f32 %v212_v59, %v52_v58  ;;  %v233_v58 = vld [vmem:[%s2273_s1 + $0x1f0] sm:$0xff] }
  0xda   :  { %531 = vst.msk [vmem:[%s2274_s2 + $0x130] sm:$0xff] %vm491_vm0, %v369_v52 }
  0xe1   :  { %v53_v62 = vld [vmem:[%s2272_s0 + $0x150] sm:$0xff]  ;;  %v54_v0 = vld [vmem:[%s2272_s0 + $0x158] sm:$0x3f] }
  0xe2   :  { %532 = vst.msk [vmem:[%s2274_s2 + $0x138] sm:$0x3f] %vm493_vm1, %v370_v56  ;;  %v373_v1 = vadd.f32 %v213_v63, %v53_v62  ;;  %v374_v5 = vadd.f32 %v214_v2, %v54_v0  ;;  %v232_v56 = vld [vmem:[%s2273_s1 + $0x1e8] sm:$0x3f]  ;;  %v234_v62 = vld [vmem:[%s2273_s1 + $0x1f8] sm:$0x3f] }
  0xe9   :  { %v55_v3 = vld [vmem:[%s2272_s0 + $0x160] sm:$0xff] }
  0xea   :  { %533 = vst.msk [vmem:[%s2274_s2 + $0x140] sm:$0xff] %vm491_vm0, %v371_v60  ;;  %v375_v6 = vadd.f32 %v215_v4, %v55_v3  ;;  %v236_v3 = vld [vmem:[%s2273_s1 + $0x208] sm:$0x3f] }
  0xeb   :  { %534 = vst.msk [vmem:[%s2274_s2 + $0x148] sm:$0x3f] %vm493_vm1, %v372_v61 }
  0xf2   :  { %v56_v7 = vld [vmem:[%s2272_s0 + $0x168] sm:$0x3f]  ;;  %v57_v9 = vld [vmem:[%s2272_s0 + $0x170] sm:$0xff] }
  0xf3   :  { %535 = vst.msk [vmem:[%s2274_s2 + $0x150] sm:$0xff] %vm491_vm0, %v373_v1  ;;  %v376_v10 = vadd.f32 %v216_v8, %v56_v7  ;;  %v377_v14 = vadd.f32 %v217_v11, %v57_v9  ;;  %v235_v1 = vld [vmem:[%s2273_s1 + $0x200] sm:$0xff]  ;;  %v237_v7 = vld [vmem:[%s2273_s1 + $0x210] sm:$0xff] }
  0xfa   :  { %v58_v12 = vld [vmem:[%s2272_s0 + $0x178] sm:$0x3f] }
  0xfb   :  { %536 = vst.msk [vmem:[%s2274_s2 + $0x158] sm:$0x3f] %vm493_vm1, %v374_v5  ;;  %v378_v15 = vadd.f32 %v218_v13, %v58_v12  ;;  %v239_v12 = vld [vmem:[%s2273_s1 + $0x220] sm:$0xff] }
  0xfc   :  { %537 = vst.msk [vmem:[%s2274_s2 + $0x160] sm:$0xff] %vm491_vm0, %v375_v6 }
 0x103   :  { %v59_v16 = vld [vmem:[%s2272_s0 + $0x180] sm:$0xff]  ;;  %v60_v18 = vld [vmem:[%s2272_s0 + $0x188] sm:$0x3f] }
 0x104   :  { %538 = vst.msk [vmem:[%s2274_s2 + $0x168] sm:$0x3f] %vm493_vm1, %v376_v10  ;;  %v379_v19 = vadd.f32 %v219_v17, %v59_v16  ;;  %v380_v23 = vadd.f32 %v220_v20, %v60_v18  ;;  %v238_v10 = vld [vmem:[%s2273_s1 + $0x218] sm:$0x3f]  ;;  %v240_v16 = vld [vmem:[%s2273_s1 + $0x228] sm:$0x3f] }
 0x10b   :  { %v61_v21 = vld [vmem:[%s2272_s0 + $0x190] sm:$0xff] }
 0x10c   :  { %539 = vst.msk [vmem:[%s2274_s2 + $0x170] sm:$0xff] %vm491_vm0, %v377_v14  ;;  %v381_v24 = vadd.f32 %v221_v22, %v61_v21  ;;  %v242_v21 = vld [vmem:[%s2273_s1 + $0x238] sm:$0x3f] }
 0x10d   :  { %540 = vst.msk [vmem:[%s2274_s2 + $0x178] sm:$0x3f] %vm493_vm1, %v378_v15 }
 0x114   :  { %v62_v25 = vld [vmem:[%s2272_s0 + $0x198] sm:$0x3f]  ;;  %v63_v27 = vld [vmem:[%s2272_s0 + $0x1a0] sm:$0xff] }
 0x115   :  { %541 = vst.msk [vmem:[%s2274_s2 + $0x180] sm:$0xff] %vm491_vm0, %v379_v19  ;;  %v382_v28 = vadd.f32 %v222_v26, %v62_v25  ;;  %v383_v32 = vadd.f32 %v223_v29, %v63_v27  ;;  %v241_v19 = vld [vmem:[%s2273_s1 + $0x230] sm:$0xff]  ;;  %v243_v25 = vld [vmem:[%s2273_s1 + $0x240] sm:$0xff] }
 0x11c   :  { %v64_v30 = vld [vmem:[%s2272_s0 + $0x1a8] sm:$0x3f] }
 0x11d   :  { %542 = vst.msk [vmem:[%s2274_s2 + $0x188] sm:$0x3f] %vm493_vm1, %v380_v23  ;;  %v384_v33 = vadd.f32 %v224_v31, %v64_v30  ;;  %v245_v30 = vld [vmem:[%s2273_s1 + $0x250] sm:$0xff] }
 0x11e   :  { %543 = vst.msk [vmem:[%s2274_s2 + $0x190] sm:$0xff] %vm491_vm0, %v381_v24 }
 0x125   :  { %v65_v34 = vld [vmem:[%s2272_s0 + $0x1b0] sm:$0xff]  ;;  %v66_v36 = vld [vmem:[%s2272_s0 + $0x1b8] sm:$0x3f] }
 0x126   :  { %544 = vst.msk [vmem:[%s2274_s2 + $0x198] sm:$0x3f] %vm493_vm1, %v382_v28  ;;  %v385_v37 = vadd.f32 %v225_v35, %v65_v34  ;;  %v386_v41 = vadd.f32 %v226_v38, %v66_v36  ;;  %v244_v28 = vld [vmem:[%s2273_s1 + $0x248] sm:$0x3f]  ;;  %v246_v34 = vld [vmem:[%s2273_s1 + $0x258] sm:$0x3f] }
 0x12d   :  { %v67_v39 = vld [vmem:[%s2272_s0 + $0x1c0] sm:$0xff] }
 0x12e   :  { %545 = vst.msk [vmem:[%s2274_s2 + $0x1a0] sm:$0xff] %vm491_vm0, %v383_v32  ;;  %v387_v42 = vadd.f32 %v227_v40, %v67_v39  ;;  %v248_v39 = vld [vmem:[%s2273_s1 + $0x268] sm:$0x3f] }
 0x12f   :  { %546 = vst.msk [vmem:[%s2274_s2 + $0x1a8] sm:$0x3f] %vm493_vm1, %v384_v33 }
 0x136   :  { %v68_v43 = vld [vmem:[%s2272_s0 + $0x1c8] sm:$0x3f]  ;;  %v69_v45 = vld [vmem:[%s2272_s0 + $0x1d0] sm:$0xff] }
 0x137   :  { %547 = vst.msk [vmem:[%s2274_s2 + $0x1b0] sm:$0xff] %vm491_vm0, %v385_v37  ;;  %v388_v46 = vadd.f32 %v228_v44, %v68_v43  ;;  %v389_v50 = vadd.f32 %v229_v47, %v69_v45  ;;  %v247_v37 = vld [vmem:[%s2273_s1 + $0x260] sm:$0xff]  ;;  %v249_v43 = vld [vmem:[%s2273_s1 + $0x270] sm:$0xff] }
 0x13e   :  { %v70_v48 = vld [vmem:[%s2272_s0 + $0x1d8] sm:$0x3f] }
 0x13f   :  { %548 = vst.msk [vmem:[%s2274_s2 + $0x1b8] sm:$0x3f] %vm493_vm1, %v386_v41  ;;  %v390_v51 = vadd.f32 %v230_v49, %v70_v48  ;;  %v251_v48 = vld [vmem:[%s2273_s1 + $0x280] sm:$0xff] }
 0x140   :  { %549 = vst.msk [vmem:[%s2274_s2 + $0x1c0] sm:$0xff] %vm491_vm0, %v387_v42 }
 0x147   :  { %v71_v52 = vld [vmem:[%s2272_s0 + $0x1e0] sm:$0xff]  ;;  %v72_v54 = vld [vmem:[%s2272_s0 + $0x1e8] sm:$0x3f] }
 0x148   :  { %550 = vst.msk [vmem:[%s2274_s2 + $0x1c8] sm:$0x3f] %vm493_vm1, %v388_v46  ;;  %v391_v55 = vadd.f32 %v231_v53, %v71_v52  ;;  %v392_v59 = vadd.f32 %v232_v56, %v72_v54  ;;  %v250_v46 = vld [vmem:[%s2273_s1 + $0x278] sm:$0x3f]  ;;  %v252_v52 = vld [vmem:[%s2273_s1 + $0x288] sm:$0x3f] }
 0x14f   :  { %v73_v57 = vld [vmem:[%s2272_s0 + $0x1f0] sm:$0xff] }
 0x150   :  { %551 = vst.msk [vmem:[%s2274_s2 + $0x1d0] sm:$0xff] %vm491_vm0, %v389_v50  ;;  %v393_v60 = vadd.f32 %v233_v58, %v73_v57  ;;  %v254_v57 = vld [vmem:[%s2273_s1 + $0x298] sm:$0x3f] }
 0x151   :  { %552 = vst.msk [vmem:[%s2274_s2 + $0x1d8] sm:$0x3f] %vm493_vm1, %v390_v51 }
 0x158   :  { %v74_v61 = vld [vmem:[%s2272_s0 + $0x1f8] sm:$0x3f]  ;;  %v75_v63 = vld [vmem:[%s2272_s0 + $0x200] sm:$0xff] }
 0x159   :  { %553 = vst.msk [vmem:[%s2274_s2 + $0x1e0] sm:$0xff] %vm491_vm0, %v391_v55  ;;  %v394_v0 = vadd.f32 %v234_v62, %v74_v61  ;;  %v395_v4 = vadd.f32 %v235_v1, %v75_v63  ;;  %v253_v55 = vld [vmem:[%s2273_s1 + $0x290] sm:$0xff]  ;;  %v255_v61 = vld [vmem:[%s2273_s1 + $0x2a0] sm:$0xff] }
 0x160   :  { %v76_v2 = vld [vmem:[%s2272_s0 + $0x208] sm:$0x3f] }
 0x161   :  { %554 = vst.msk [vmem:[%s2274_s2 + $0x1e8] sm:$0x3f] %vm493_vm1, %v392_v59  ;;  %v396_v5 = vadd.f32 %v236_v3, %v76_v2  ;;  %v257_v2 = vld [vmem:[%s2273_s1 + $0x2b0] sm:$0xff] }
 0x162   :  { %555 = vst.msk [vmem:[%s2274_s2 + $0x1f0] sm:$0xff] %vm491_vm0, %v393_v60 }
 0x169   :  { %v77_v6 = vld [vmem:[%s2272_s0 + $0x210] sm:$0xff]  ;;  %v78_v8 = vld [vmem:[%s2272_s0 + $0x218] sm:$0x3f] }
 0x16a   :  { %556 = vst.msk [vmem:[%s2274_s2 + $0x1f8] sm:$0x3f] %vm493_vm1, %v394_v0  ;;  %v397_v9 = vadd.f32 %v237_v7, %v77_v6  ;;  %v398_v13 = vadd.f32 %v238_v10, %v78_v8  ;;  %v256_v0 = vld [vmem:[%s2273_s1 + $0x2a8] sm:$0x3f]  ;;  %v258_v6 = vld [vmem:[%s2273_s1 + $0x2b8] sm:$0x3f] }
 0x171   :  { %v79_v11 = vld [vmem:[%s2272_s0 + $0x220] sm:$0xff] }
 0x172   :  { %557 = vst.msk [vmem:[%s2274_s2 + $0x200] sm:$0xff] %vm491_vm0, %v395_v4  ;;  %v399_v14 = vadd.f32 %v239_v12, %v79_v11  ;;  %v260_v11 = vld [vmem:[%s2273_s1 + $0x2c8] sm:$0x3f] }
 0x173   :  { %558 = vst.msk [vmem:[%s2274_s2 + $0x208] sm:$0x3f] %vm493_vm1, %v396_v5 }
 0x17a   :  { %v80_v15 = vld [vmem:[%s2272_s0 + $0x228] sm:$0x3f]  ;;  %v81_v17 = vld [vmem:[%s2272_s0 + $0x230] sm:$0xff] }
 0x17b   :  { %559 = vst.msk [vmem:[%s2274_s2 + $0x210] sm:$0xff] %vm491_vm0, %v397_v9  ;;  %v400_v18 = vadd.f32 %v240_v16, %v80_v15  ;;  %v401_v22 = vadd.f32 %v241_v19, %v81_v17  ;;  %v259_v9 = vld [vmem:[%s2273_s1 + $0x2c0] sm:$0xff]  ;;  %v261_v15 = vld [vmem:[%s2273_s1 + $0x2d0] sm:$0xff] }
 0x182   :  { %v82_v20 = vld [vmem:[%s2272_s0 + $0x238] sm:$0x3f] }
 0x183   :  { %560 = vst.msk [vmem:[%s2274_s2 + $0x218] sm:$0x3f] %vm493_vm1, %v398_v13  ;;  %v402_v23 = vadd.f32 %v242_v21, %v82_v20  ;;  %v263_v20 = vld [vmem:[%s2273_s1 + $0x2e0] sm:$0xff] }
 0x184   :  { %561 = vst.msk [vmem:[%s2274_s2 + $0x220] sm:$0xff] %vm491_vm0, %v399_v14 }
 0x18b   :  { %v83_v24 = vld [vmem:[%s2272_s0 + $0x240] sm:$0xff]  ;;  %v84_v26 = vld [vmem:[%s2272_s0 + $0x248] sm:$0x3f] }
 0x18c   :  { %562 = vst.msk [vmem:[%s2274_s2 + $0x228] sm:$0x3f] %vm493_vm1, %v400_v18  ;;  %v403_v27 = vadd.f32 %v243_v25, %v83_v24  ;;  %v404_v31 = vadd.f32 %v244_v28, %v84_v26  ;;  %v262_v18 = vld [vmem:[%s2273_s1 + $0x2d8] sm:$0x3f]  ;;  %v264_v24 = vld [vmem:[%s2273_s1 + $0x2e8] sm:$0x3f] }
 0x193   :  { %v85_v29 = vld [vmem:[%s2272_s0 + $0x250] sm:$0xff] }
 0x194   :  { %563 = vst.msk [vmem:[%s2274_s2 + $0x230] sm:$0xff] %vm491_vm0, %v401_v22  ;;  %v405_v32 = vadd.f32 %v245_v30, %v85_v29  ;;  %v266_v29 = vld [vmem:[%s2273_s1 + $0x2f8] sm:$0x3f] }
 0x195   :  { %564 = vst.msk [vmem:[%s2274_s2 + $0x238] sm:$0x3f] %vm493_vm1, %v402_v23 }
 0x19c   :  { %v86_v33 = vld [vmem:[%s2272_s0 + $0x258] sm:$0x3f]  ;;  %v87_v35 = vld [vmem:[%s2272_s0 + $0x260] sm:$0xff] }
 0x19d   :  { %565 = vst.msk [vmem:[%s2274_s2 + $0x240] sm:$0xff] %vm491_vm0, %v403_v27  ;;  %v406_v36 = vadd.f32 %v246_v34, %v86_v33  ;;  %v407_v40 = vadd.f32 %v247_v37, %v87_v35  ;;  %v265_v27 = vld [vmem:[%s2273_s1 + $0x2f0] sm:$0xff]  ;;  %v267_v33 = vld [vmem:[%s2273_s1 + $0x300] sm:$0xff] }
 0x1a4   :  { %v88_v38 = vld [vmem:[%s2272_s0 + $0x268] sm:$0x3f] }
 0x1a5   :  { %566 = vst.msk [vmem:[%s2274_s2 + $0x248] sm:$0x3f] %vm493_vm1, %v404_v31  ;;  %v408_v41 = vadd.f32 %v248_v39, %v88_v38  ;;  %v269_v38 = vld [vmem:[%s2273_s1 + $0x310] sm:$0xff] }
 0x1a6   :  { %567 = vst.msk [vmem:[%s2274_s2 + $0x250] sm:$0xff] %vm491_vm0, %v405_v32 }
 0x1ad   :  { %v89_v42 = vld [vmem:[%s2272_s0 + $0x270] sm:$0xff]  ;;  %v90_v44 = vld [vmem:[%s2272_s0 + $0x278] sm:$0x3f] }
 0x1ae   :  { %568 = vst.msk [vmem:[%s2274_s2 + $0x258] sm:$0x3f] %vm493_vm1, %v406_v36  ;;  %v409_v45 = vadd.f32 %v249_v43, %v89_v42  ;;  %v410_v49 = vadd.f32 %v250_v46, %v90_v44  ;;  %v268_v36 = vld [vmem:[%s2273_s1 + $0x308] sm:$0x3f]  ;;  %v270_v42 = vld [vmem:[%s2273_s1 + $0x318] sm:$0x3f] }
 0x1b5   :  { %v91_v47 = vld [vmem:[%s2272_s0 + $0x280] sm:$0xff] }
 0x1b6   :  { %569 = vst.msk [vmem:[%s2274_s2 + $0x260] sm:$0xff] %vm491_vm0, %v407_v40  ;;  %v411_v50 = vadd.f32 %v251_v48, %v91_v47  ;;  %v272_v47 = vld [vmem:[%s2273_s1 + $0x328] sm:$0x3f] }
 0x1b7   :  { %570 = vst.msk [vmem:[%s2274_s2 + $0x268] sm:$0x3f] %vm493_vm1, %v408_v41 }
 0x1be   :  { %v92_v51 = vld [vmem:[%s2272_s0 + $0x288] sm:$0x3f]  ;;  %v93_v53 = vld [vmem:[%s2272_s0 + $0x290] sm:$0xff] }
 0x1bf   :  { %571 = vst.msk [vmem:[%s2274_s2 + $0x270] sm:$0xff] %vm491_vm0, %v409_v45  ;;  %v412_v54 = vadd.f32 %v252_v52, %v92_v51  ;;  %v413_v58 = vadd.f32 %v253_v55, %v93_v53  ;;  %v271_v45 = vld [vmem:[%s2273_s1 + $0x320] sm:$0xff]  ;;  %v273_v51 = vld [vmem:[%s2273_s1 + $0x330] sm:$0xff] }
 0x1c6   :  { %v94_v56 = vld [vmem:[%s2272_s0 + $0x298] sm:$0x3f] }
 0x1c7   :  { %572 = vst.msk [vmem:[%s2274_s2 + $0x278] sm:$0x3f] %vm493_vm1, %v410_v49  ;;  %v414_v59 = vadd.f32 %v254_v57, %v94_v56  ;;  %v275_v56 = vld [vmem:[%s2273_s1 + $0x340] sm:$0xff] }
 0x1c8   :  { %573 = vst.msk [vmem:[%s2274_s2 + $0x280] sm:$0xff] %vm491_vm0, %v411_v50 }
 0x1cf   :  { %v95_v60 = vld [vmem:[%s2272_s0 + $0x2a0] sm:$0xff]  ;;  %v96_v62 = vld [vmem:[%s2272_s0 + $0x2a8] sm:$0x3f] }
 0x1d0   :  { %574 = vst.msk [vmem:[%s2274_s2 + $0x288] sm:$0x3f] %vm493_vm1, %v412_v54  ;;  %v415_v63 = vadd.f32 %v255_v61, %v95_v60  ;;  %v416_v3 = vadd.f32 %v256_v0, %v96_v62  ;;  %v274_v54 = vld [vmem:[%s2273_s1 + $0x338] sm:$0x3f]  ;;  %v276_v60 = vld [vmem:[%s2273_s1 + $0x348] sm:$0x3f] }
 0x1d7   :  { %v97_v1 = vld [vmem:[%s2272_s0 + $0x2b0] sm:$0xff] }
 0x1d8   :  { %575 = vst.msk [vmem:[%s2274_s2 + $0x290] sm:$0xff] %vm491_vm0, %v413_v58  ;;  %v417_v4 = vadd.f32 %v257_v2, %v97_v1  ;;  %v278_v1 = vld [vmem:[%s2273_s1 + $0x358] sm:$0x3f] }
 0x1d9   :  { %576 = vst.msk [vmem:[%s2274_s2 + $0x298] sm:$0x3f] %vm493_vm1, %v414_v59 }
 0x1e0   :  { %v98_v5 = vld [vmem:[%s2272_s0 + $0x2b8] sm:$0x3f]  ;;  %v99_v7 = vld [vmem:[%s2272_s0 + $0x2c0] sm:$0xff] }
 0x1e1   :  { %577 = vst.msk [vmem:[%s2274_s2 + $0x2a0] sm:$0xff] %vm491_vm0, %v415_v63  ;;  %v418_v8 = vadd.f32 %v258_v6, %v98_v5  ;;  %v419_v12 = vadd.f32 %v259_v9, %v99_v7  ;;  %v277_v63 = vld [vmem:[%s2273_s1 + $0x350] sm:$0xff]  ;;  %v279_v5 = vld [vmem:[%s2273_s1 + $0x360] sm:$0xff] }
 0x1e8   :  { %v100_v10 = vld [vmem:[%s2272_s0 + $0x2c8] sm:$0x3f] }
 0x1e9   :  { %578 = vst.msk [vmem:[%s2274_s2 + $0x2a8] sm:$0x3f] %vm493_vm1, %v416_v3  ;;  %v420_v13 = vadd.f32 %v260_v11, %v100_v10  ;;  %v281_v10 = vld [vmem:[%s2273_s1 + $0x370] sm:$0xff] }
 0x1ea   :  { %579 = vst.msk [vmem:[%s2274_s2 + $0x2b0] sm:$0xff] %vm491_vm0, %v417_v4 }
 0x1f1   :  { %v101_v14 = vld [vmem:[%s2272_s0 + $0x2d0] sm:$0xff]  ;;  %v102_v16 = vld [vmem:[%s2272_s0 + $0x2d8] sm:$0x3f] }
 0x1f2   :  { %580 = vst.msk [vmem:[%s2274_s2 + $0x2b8] sm:$0x3f] %vm493_vm1, %v418_v8  ;;  %v421_v17 = vadd.f32 %v261_v15, %v101_v14  ;;  %v422_v21 = vadd.f32 %v262_v18, %v102_v16  ;;  %v280_v8 = vld [vmem:[%s2273_s1 + $0x368] sm:$0x3f]  ;;  %v282_v14 = vld [vmem:[%s2273_s1 + $0x378] sm:$0x3f] }
 0x1f9   :  { %v103_v19 = vld [vmem:[%s2272_s0 + $0x2e0] sm:$0xff] }
 0x1fa   :  { %581 = vst.msk [vmem:[%s2274_s2 + $0x2c0] sm:$0xff] %vm491_vm0, %v419_v12  ;;  %v423_v22 = vadd.f32 %v263_v20, %v103_v19  ;;  %v284_v19 = vld [vmem:[%s2273_s1 + $0x388] sm:$0x3f] }
 0x1fb   :  { %582 = vst.msk [vmem:[%s2274_s2 + $0x2c8] sm:$0x3f] %vm493_vm1, %v420_v13 }
 0x202   :  { %v104_v23 = vld [vmem:[%s2272_s0 + $0x2e8] sm:$0x3f]  ;;  %v105_v25 = vld [vmem:[%s2272_s0 + $0x2f0] sm:$0xff] }
 0x203   :  { %583 = vst.msk [vmem:[%s2274_s2 + $0x2d0] sm:$0xff] %vm491_vm0, %v421_v17  ;;  %v424_v26 = vadd.f32 %v264_v24, %v104_v23  ;;  %v425_v30 = vadd.f32 %v265_v27, %v105_v25  ;;  %v283_v17 = vld [vmem:[%s2273_s1 + $0x380] sm:$0xff]  ;;  %v285_v23 = vld [vmem:[%s2273_s1 + $0x390] sm:$0xff] }
 0x20a   :  { %v106_v28 = vld [vmem:[%s2272_s0 + $0x2f8] sm:$0x3f] }
 0x20b   :  { %584 = vst.msk [vmem:[%s2274_s2 + $0x2d8] sm:$0x3f] %vm493_vm1, %v422_v21  ;;  %v426_v31 = vadd.f32 %v266_v29, %v106_v28  ;;  %v287_v28 = vld [vmem:[%s2273_s1 + $0x3a0] sm:$0xff] }
 0x20c   :  { %585 = vst.msk [vmem:[%s2274_s2 + $0x2e0] sm:$0xff] %vm491_vm0, %v423_v22 }
 0x213   :  { %v107_v32 = vld [vmem:[%s2272_s0 + $0x300] sm:$0xff]  ;;  %v108_v34 = vld [vmem:[%s2272_s0 + $0x308] sm:$0x3f] }
 0x214   :  { %586 = vst.msk [vmem:[%s2274_s2 + $0x2e8] sm:$0x3f] %vm493_vm1, %v424_v26  ;;  %v427_v35 = vadd.f32 %v267_v33, %v107_v32  ;;  %v428_v39 = vadd.f32 %v268_v36, %v108_v34  ;;  %v286_v26 = vld [vmem:[%s2273_s1 + $0x398] sm:$0x3f]  ;;  %v288_v32 = vld [vmem:[%s2273_s1 + $0x3a8] sm:$0x3f] }
 0x21b   :  { %v109_v37 = vld [vmem:[%s2272_s0 + $0x310] sm:$0xff] }
 0x21c   :  { %587 = vst.msk [vmem:[%s2274_s2 + $0x2f0] sm:$0xff] %vm491_vm0, %v425_v30  ;;  %v429_v40 = vadd.f32 %v269_v38, %v109_v37  ;;  %v290_v37 = vld [vmem:[%s2273_s1 + $0x3b8] sm:$0x3f] }
 0x21d   :  { %588 = vst.msk [vmem:[%s2274_s2 + $0x2f8] sm:$0x3f] %vm493_vm1, %v426_v31 }
 0x224   :  { %v110_v41 = vld [vmem:[%s2272_s0 + $0x318] sm:$0x3f]  ;;  %v111_v43 = vld [vmem:[%s2272_s0 + $0x320] sm:$0xff] }
 0x225   :  { %589 = vst.msk [vmem:[%s2274_s2 + $0x300] sm:$0xff] %vm491_vm0, %v427_v35  ;;  %v430_v44 = vadd.f32 %v270_v42, %v110_v41  ;;  %v431_v48 = vadd.f32 %v271_v45, %v111_v43  ;;  %v289_v35 = vld [vmem:[%s2273_s1 + $0x3b0] sm:$0xff]  ;;  %v291_v41 = vld [vmem:[%s2273_s1 + $0x3c0] sm:$0xff] }
 0x22c   :  { %v112_v46 = vld [vmem:[%s2272_s0 + $0x328] sm:$0x3f] }
 0x22d   :  { %590 = vst.msk [vmem:[%s2274_s2 + $0x308] sm:$0x3f] %vm493_vm1, %v428_v39  ;;  %v432_v49 = vadd.f32 %v272_v47, %v112_v46  ;;  %v293_v46 = vld [vmem:[%s2273_s1 + $0x3d0] sm:$0xff] }
 0x22e   :  { %591 = vst.msk [vmem:[%s2274_s2 + $0x310] sm:$0xff] %vm491_vm0, %v429_v40 }
 0x235   :  { %v113_v50 = vld [vmem:[%s2272_s0 + $0x330] sm:$0xff]  ;;  %v114_v52 = vld [vmem:[%s2272_s0 + $0x338] sm:$0x3f] }
 0x236   :  { %592 = vst.msk [vmem:[%s2274_s2 + $0x318] sm:$0x3f] %vm493_vm1, %v430_v44  ;;  %v433_v53 = vadd.f32 %v273_v51, %v113_v50  ;;  %v434_v57 = vadd.f32 %v274_v54, %v114_v52  ;;  %v292_v44 = vld [vmem:[%s2273_s1 + $0x3c8] sm:$0x3f]  ;;  %v294_v50 = vld [vmem:[%s2273_s1 + $0x3d8] sm:$0x3f] }
 0x23d   :  { %v115_v55 = vld [vmem:[%s2272_s0 + $0x340] sm:$0xff] }
 0x23e   :  { %593 = vst.msk [vmem:[%s2274_s2 + $0x320] sm:$0xff] %vm491_vm0, %v431_v48  ;;  %v435_v58 = vadd.f32 %v275_v56, %v115_v55  ;;  %v296_v55 = vld [vmem:[%s2273_s1 + $0x3e8] sm:$0x3f] }
 0x23f   :  { %594 = vst.msk [vmem:[%s2274_s2 + $0x328] sm:$0x3f] %vm493_vm1, %v432_v49 }
 0x246   :  { %v116_v59 = vld [vmem:[%s2272_s0 + $0x348] sm:$0x3f]  ;;  %v117_v61 = vld [vmem:[%s2272_s0 + $0x350] sm:$0xff] }
 0x247   :  { %595 = vst.msk [vmem:[%s2274_s2 + $0x330] sm:$0xff] %vm491_vm0, %v433_v53  ;;  %v436_v62 = vadd.f32 %v276_v60, %v116_v59  ;;  %v437_v2 = vadd.f32 %v277_v63, %v117_v61  ;;  %v295_v53 = vld [vmem:[%s2273_s1 + $0x3e0] sm:$0xff]  ;;  %v297_v59 = vld [vmem:[%s2273_s1 + $0x3f0] sm:$0xff] }
 0x24e   :  { %v118_v0 = vld [vmem:[%s2272_s0 + $0x358] sm:$0x3f] }
 0x24f   :  { %596 = vst.msk [vmem:[%s2274_s2 + $0x338] sm:$0x3f] %vm493_vm1, %v434_v57  ;;  %v438_v3 = vadd.f32 %v278_v1, %v118_v0  ;;  %v299_v0 = vld [vmem:[%s2273_s1 + $0x400] sm:$0xff] }
 0x250   :  { %597 = vst.msk [vmem:[%s2274_s2 + $0x340] sm:$0xff] %vm491_vm0, %v435_v58 }
 0x257   :  { %v119_v4 = vld [vmem:[%s2272_s0 + $0x360] sm:$0xff]  ;;  %v120_v6 = vld [vmem:[%s2272_s0 + $0x368] sm:$0x3f] }
 0x258   :  { %598 = vst.msk [vmem:[%s2274_s2 + $0x348] sm:$0x3f] %vm493_vm1, %v436_v62  ;;  %v439_v7 = vadd.f32 %v279_v5, %v119_v4  ;;  %v440_v11 = vadd.f32 %v280_v8, %v120_v6  ;;  %v298_v62 = vld [vmem:[%s2273_s1 + $0x3f8] sm:$0x3f]  ;;  %v300_v4 = vld [vmem:[%s2273_s1 + $0x408] sm:$0x3f] }
 0x25f   :  { %v121_v9 = vld [vmem:[%s2272_s0 + $0x370] sm:$0xff] }
 0x260   :  { %599 = vst.msk [vmem:[%s2274_s2 + $0x350] sm:$0xff] %vm491_vm0, %v437_v2  ;;  %v441_v12 = vadd.f32 %v281_v10, %v121_v9  ;;  %v302_v9 = vld [vmem:[%s2273_s1 + $0x418] sm:$0x3f] }
 0x261   :  { %600 = vst.msk [vmem:[%s2274_s2 + $0x358] sm:$0x3f] %vm493_vm1, %v438_v3 }
 0x268   :  { %v122_v13 = vld [vmem:[%s2272_s0 + $0x378] sm:$0x3f]  ;;  %v123_v15 = vld [vmem:[%s2272_s0 + $0x380] sm:$0xff] }
 0x269   :  { %601 = vst.msk [vmem:[%s2274_s2 + $0x360] sm:$0xff] %vm491_vm0, %v439_v7  ;;  %v442_v16 = vadd.f32 %v282_v14, %v122_v13  ;;  %v443_v20 = vadd.f32 %v283_v17, %v123_v15  ;;  %v301_v7 = vld [vmem:[%s2273_s1 + $0x410] sm:$0xff]  ;;  %v303_v13 = vld [vmem:[%s2273_s1 + $0x420] sm:$0xff] }
 0x270   :  { %v124_v18 = vld [vmem:[%s2272_s0 + $0x388] sm:$0x3f] }
 0x271   :  { %602 = vst.msk [vmem:[%s2274_s2 + $0x368] sm:$0x3f] %vm493_vm1, %v440_v11  ;;  %v444_v21 = vadd.f32 %v284_v19, %v124_v18  ;;  %v305_v18 = vld [vmem:[%s2273_s1 + $0x430] sm:$0xff] }
 0x272   :  { %603 = vst.msk [vmem:[%s2274_s2 + $0x370] sm:$0xff] %vm491_vm0, %v441_v12 }
 0x279   :  { %v125_v22 = vld [vmem:[%s2272_s0 + $0x390] sm:$0xff]  ;;  %v126_v24 = vld [vmem:[%s2272_s0 + $0x398] sm:$0x3f] }
 0x27a   :  { %604 = vst.msk [vmem:[%s2274_s2 + $0x378] sm:$0x3f] %vm493_vm1, %v442_v16  ;;  %v445_v25 = vadd.f32 %v285_v23, %v125_v22  ;;  %v446_v29 = vadd.f32 %v286_v26, %v126_v24  ;;  %v304_v16 = vld [vmem:[%s2273_s1 + $0x428] sm:$0x3f]  ;;  %v306_v22 = vld [vmem:[%s2273_s1 + $0x438] sm:$0x3f] }
 0x281   :  { %v127_v27 = vld [vmem:[%s2272_s0 + $0x3a0] sm:$0xff] }
 0x282   :  { %605 = vst.msk [vmem:[%s2274_s2 + $0x380] sm:$0xff] %vm491_vm0, %v443_v20  ;;  %v447_v30 = vadd.f32 %v287_v28, %v127_v27  ;;  %v308_v27 = vld [vmem:[%s2273_s1 + $0x448] sm:$0x3f] }
 0x283   :  { %606 = vst.msk [vmem:[%s2274_s2 + $0x388] sm:$0x3f] %vm493_vm1, %v444_v21 }
 0x28a   :  { %v128_v31 = vld [vmem:[%s2272_s0 + $0x3a8] sm:$0x3f]  ;;  %v129_v33 = vld [vmem:[%s2272_s0 + $0x3b0] sm:$0xff] }
 0x28b   :  { %607 = vst.msk [vmem:[%s2274_s2 + $0x390] sm:$0xff] %vm491_vm0, %v445_v25  ;;  %v448_v34 = vadd.f32 %v288_v32, %v128_v31  ;;  %v449_v38 = vadd.f32 %v289_v35, %v129_v33  ;;  %v307_v25 = vld [vmem:[%s2273_s1 + $0x440] sm:$0xff]  ;;  %v309_v31 = vld [vmem:[%s2273_s1 + $0x450] sm:$0xff] }
 0x292   :  { %v130_v36 = vld [vmem:[%s2272_s0 + $0x3b8] sm:$0x3f] }
 0x293   :  { %608 = vst.msk [vmem:[%s2274_s2 + $0x398] sm:$0x3f] %vm493_vm1, %v446_v29  ;;  %v450_v39 = vadd.f32 %v290_v37, %v130_v36  ;;  %v311_v36 = vld [vmem:[%s2273_s1 + $0x460] sm:$0xff] }
 0x294   :  { %609 = vst.msk [vmem:[%s2274_s2 + $0x3a0] sm:$0xff] %vm491_vm0, %v447_v30 }
 0x29b   :  { %v131_v40 = vld [vmem:[%s2272_s0 + $0x3c0] sm:$0xff]  ;;  %v132_v42 = vld [vmem:[%s2272_s0 + $0x3c8] sm:$0x3f] }
 0x29c   :  { %610 = vst.msk [vmem:[%s2274_s2 + $0x3a8] sm:$0x3f] %vm493_vm1, %v448_v34  ;;  %v451_v43 = vadd.f32 %v291_v41, %v131_v40  ;;  %v452_v47 = vadd.f32 %v292_v44, %v132_v42  ;;  %v310_v34 = vld [vmem:[%s2273_s1 + $0x458] sm:$0x3f]  ;;  %v312_v40 = vld [vmem:[%s2273_s1 + $0x468] sm:$0x3f] }
 0x2a3   :  { %v133_v45 = vld [vmem:[%s2272_s0 + $0x3d0] sm:$0xff] }
 0x2a4   :  { %611 = vst.msk [vmem:[%s2274_s2 + $0x3b0] sm:$0xff] %vm491_vm0, %v449_v38  ;;  %v453_v48 = vadd.f32 %v293_v46, %v133_v45  ;;  %v314_v45 = vld [vmem:[%s2273_s1 + $0x478] sm:$0x3f] }
 0x2a5   :  { %612 = vst.msk [vmem:[%s2274_s2 + $0x3b8] sm:$0x3f] %vm493_vm1, %v450_v39 }
 0x2ac   :  { %v134_v49 = vld [vmem:[%s2272_s0 + $0x3d8] sm:$0x3f]  ;;  %v135_v51 = vld [vmem:[%s2272_s0 + $0x3e0] sm:$0xff] }
 0x2ad   :  { %613 = vst.msk [vmem:[%s2274_s2 + $0x3c0] sm:$0xff] %vm491_vm0, %v451_v43  ;;  %v454_v52 = vadd.f32 %v294_v50, %v134_v49  ;;  %v455_v56 = vadd.f32 %v295_v53, %v135_v51  ;;  %v313_v43 = vld [vmem:[%s2273_s1 + $0x470] sm:$0xff]  ;;  %v315_v49 = vld [vmem:[%s2273_s1 + $0x480] sm:$0xff] }
 0x2b4   :  { %v136_v54 = vld [vmem:[%s2272_s0 + $0x3e8] sm:$0x3f] }
 0x2b5   :  { %614 = vst.msk [vmem:[%s2274_s2 + $0x3c8] sm:$0x3f] %vm493_vm1, %v452_v47  ;;  %v456_v57 = vadd.f32 %v296_v55, %v136_v54  ;;  %v317_v54 = vld [vmem:[%s2273_s1 + $0x490] sm:$0xff] }
 0x2b6   :  { %615 = vst.msk [vmem:[%s2274_s2 + $0x3d0] sm:$0xff] %vm491_vm0, %v453_v48 }
 0x2bd   :  { %v137_v58 = vld [vmem:[%s2272_s0 + $0x3f0] sm:$0xff]  ;;  %v138_v60 = vld [vmem:[%s2272_s0 + $0x3f8] sm:$0x3f] }
 0x2be   :  { %616 = vst.msk [vmem:[%s2274_s2 + $0x3d8] sm:$0x3f] %vm493_vm1, %v454_v52  ;;  %v457_v61 = vadd.f32 %v297_v59, %v137_v58  ;;  %v458_v1 = vadd.f32 %v298_v62, %v138_v60  ;;  %v316_v52 = vld [vmem:[%s2273_s1 + $0x488] sm:$0x3f]  ;;  %v318_v58 = vld [vmem:[%s2273_s1 + $0x498] sm:$0x3f] }
 0x2c5   :  { %v139_v63 = vld [vmem:[%s2272_s0 + $0x400] sm:$0xff] }
 0x2c6   :  { %617 = vst.msk [vmem:[%s2274_s2 + $0x3e0] sm:$0xff] %vm491_vm0, %v455_v56  ;;  %v459_v2 = vadd.f32 %v299_v0, %v139_v63  ;;  %v320_v63 = vld [vmem:[%s2273_s1 + $0x4a8] sm:$0x3f] }
 0x2c7   :  { %618 = vst.msk [vmem:[%s2274_s2 + $0x3e8] sm:$0x3f] %vm493_vm1, %v456_v57 }
 0x2ce   :  { %v140_v3 = vld [vmem:[%s2272_s0 + $0x408] sm:$0x3f]  ;;  %v141_v5 = vld [vmem:[%s2272_s0 + $0x410] sm:$0xff] }
 0x2cf   :  { %619 = vst.msk [vmem:[%s2274_s2 + $0x3f0] sm:$0xff] %vm491_vm0, %v457_v61  ;;  %v460_v6 = vadd.f32 %v300_v4, %v140_v3  ;;  %v461_v10 = vadd.f32 %v301_v7, %v141_v5  ;;  %v319_v61 = vld [vmem:[%s2273_s1 + $0x4a0] sm:$0xff]  ;;  %v321_v3 = vld [vmem:[%s2273_s1 + $0x4b0] sm:$0xff] }
 0x2d6   :  { %v142_v8 = vld [vmem:[%s2272_s0 + $0x418] sm:$0x3f] }
 0x2d7   :  { %620 = vst.msk [vmem:[%s2274_s2 + $0x3f8] sm:$0x3f] %vm493_vm1, %v458_v1  ;;  %v462_v11 = vadd.f32 %v302_v9, %v142_v8  ;;  %v323_v8 = vld [vmem:[%s2273_s1 + $0x4c0] sm:$0xff] }
 0x2d8   :  { %621 = vst.msk [vmem:[%s2274_s2 + $0x400] sm:$0xff] %vm491_vm0, %v459_v2 }
 0x2df   :  { %v143_v12 = vld [vmem:[%s2272_s0 + $0x420] sm:$0xff]  ;;  %v144_v14 = vld [vmem:[%s2272_s0 + $0x428] sm:$0x3f] }
 0x2e0   :  { %622 = vst.msk [vmem:[%s2274_s2 + $0x408] sm:$0x3f] %vm493_vm1, %v460_v6  ;;  %v463_v15 = vadd.f32 %v303_v13, %v143_v12  ;;  %v464_v19 = vadd.f32 %v304_v16, %v144_v14  ;;  %v322_v6 = vld [vmem:[%s2273_s1 + $0x4b8] sm:$0x3f]  ;;  %v324_v12 = vld [vmem:[%s2273_s1 + $0x4c8] sm:$0x3f] }
 0x2e7   :  { %v145_v17 = vld [vmem:[%s2272_s0 + $0x430] sm:$0xff] }
 0x2e8   :  { %623 = vst.msk [vmem:[%s2274_s2 + $0x410] sm:$0xff] %vm491_vm0, %v461_v10  ;;  %v465_v20 = vadd.f32 %v305_v18, %v145_v17  ;;  %v326_v17 = vld [vmem:[%s2273_s1 + $0x4d8] sm:$0x3f] }
 0x2e9   :  { %624 = vst.msk [vmem:[%s2274_s2 + $0x418] sm:$0x3f] %vm493_vm1, %v462_v11 }
 0x2f0   :  { %v146_v21 = vld [vmem:[%s2272_s0 + $0x438] sm:$0x3f]  ;;  %v147_v23 = vld [vmem:[%s2272_s0 + $0x440] sm:$0xff] }
 0x2f1   :  { %625 = vst.msk [vmem:[%s2274_s2 + $0x420] sm:$0xff] %vm491_vm0, %v463_v15  ;;  %v466_v24 = vadd.f32 %v306_v22, %v146_v21  ;;  %v467_v28 = vadd.f32 %v307_v25, %v147_v23  ;;  %v325_v15 = vld [vmem:[%s2273_s1 + $0x4d0] sm:$0xff]  ;;  %v327_v21 = vld [vmem:[%s2273_s1 + $0x4e0] sm:$0xff] }
 0x2f8   :  { %v148_v26 = vld [vmem:[%s2272_s0 + $0x448] sm:$0x3f] }
 0x2f9   :  { %626 = vst.msk [vmem:[%s2274_s2 + $0x428] sm:$0x3f] %vm493_vm1, %v464_v19  ;;  %v468_v29 = vadd.f32 %v308_v27, %v148_v26  ;;  %v329_v26 = vld [vmem:[%s2273_s1 + $0x4f0] sm:$0xff] }
 0x2fa   :  { %627 = vst.msk [vmem:[%s2274_s2 + $0x430] sm:$0xff] %vm491_vm0, %v465_v20 }
 0x301   :  { %v149_v30 = vld [vmem:[%s2272_s0 + $0x450] sm:$0xff]  ;;  %v150_v32 = vld [vmem:[%s2272_s0 + $0x458] sm:$0x3f] }
 0x302   :  { %628 = vst.msk [vmem:[%s2274_s2 + $0x438] sm:$0x3f] %vm493_vm1, %v466_v24  ;;  %v469_v33 = vadd.f32 %v309_v31, %v149_v30  ;;  %v470_v37 = vadd.f32 %v310_v34, %v150_v32  ;;  %v328_v24 = vld [vmem:[%s2273_s1 + $0x4e8] sm:$0x3f]  ;;  %v330_v30 = vld [vmem:[%s2273_s1 + $0x4f8] sm:$0x3f] }
 0x309   :  { %v151_v35 = vld [vmem:[%s2272_s0 + $0x460] sm:$0xff] }
 0x30a   :  { %629 = vst.msk [vmem:[%s2274_s2 + $0x440] sm:$0xff] %vm491_vm0, %v467_v28  ;;  %v471_v38 = vadd.f32 %v311_v36, %v151_v35 }
 0x30b   :  { %630 = vst.msk [vmem:[%s2274_s2 + $0x448] sm:$0x3f] %vm493_vm1, %v468_v29 }
 0x312   :  { %v152_v39 = vld [vmem:[%s2272_s0 + $0x468] sm:$0x3f]  ;;  %v153_v41 = vld [vmem:[%s2272_s0 + $0x470] sm:$0xff] }
 0x313   :  { %631 = vst.msk [vmem:[%s2274_s2 + $0x450] sm:$0xff] %vm491_vm0, %v469_v33  ;;  %v472_v42 = vadd.f32 %v312_v40, %v152_v39  ;;  %v473_v46 = vadd.f32 %v313_v43, %v153_v41 }
 0x31a   :  { %v154_v44 = vld [vmem:[%s2272_s0 + $0x478] sm:$0x3f] }
 0x31b   :  { %632 = vst.msk [vmem:[%s2274_s2 + $0x458] sm:$0x3f] %vm493_vm1, %v470_v37  ;;  %v474_v47 = vadd.f32 %v314_v45, %v154_v44 }
 0x31c   :  { %633 = vst.msk [vmem:[%s2274_s2 + $0x460] sm:$0xff] %vm491_vm0, %v471_v38 }
 0x323   :  { %v155_v48 = vld [vmem:[%s2272_s0 + $0x480] sm:$0xff]  ;;  %v156_v50 = vld [vmem:[%s2272_s0 + $0x488] sm:$0x3f] }
 0x324   :  { %634 = vst.msk [vmem:[%s2274_s2 + $0x468] sm:$0x3f] %vm493_vm1, %v472_v42  ;;  %v475_v51 = vadd.f32 %v315_v49, %v155_v48  ;;  %v476_v55 = vadd.f32 %v316_v52, %v156_v50 }
 0x32b   :  { %v157_v53 = vld [vmem:[%s2272_s0 + $0x490] sm:$0xff] }
 0x32c   :  { %635 = vst.msk [vmem:[%s2274_s2 + $0x470] sm:$0xff] %vm491_vm0, %v473_v46  ;;  %v477_v56 = vadd.f32 %v317_v54, %v157_v53 }
 0x32d   :  { %636 = vst.msk [vmem:[%s2274_s2 + $0x478] sm:$0x3f] %vm493_vm1, %v474_v47 }
 0x334   :  { %v158_v57 = vld [vmem:[%s2272_s0 + $0x498] sm:$0x3f]  ;;  %v159_v59 = vld [vmem:[%s2272_s0 + $0x4a0] sm:$0xff] }
 0x335   :  { %637 = vst.msk [vmem:[%s2274_s2 + $0x480] sm:$0xff] %vm491_vm0, %v475_v51  ;;  %v478_v60 = vadd.f32 %v318_v58, %v158_v57  ;;  %v479_v0 = vadd.f32 %v319_v61, %v159_v59 }
 0x33c   :  { %v160_v62 = vld [vmem:[%s2272_s0 + $0x4a8] sm:$0x3f] }
 0x33d   :  { %638 = vst.msk [vmem:[%s2274_s2 + $0x488] sm:$0x3f] %vm493_vm1, %v476_v55  ;;  %v480_v1 = vadd.f32 %v320_v63, %v160_v62 }
 0x33e   :  { %639 = vst.msk [vmem:[%s2274_s2 + $0x490] sm:$0xff] %vm491_vm0, %v477_v56 }
 0x345   :  { %v161_v2 = vld [vmem:[%s2272_s0 + $0x4b0] sm:$0xff]  ;;  %v162_v4 = vld [vmem:[%s2272_s0 + $0x4b8] sm:$0x3f] }
 0x346   :  { %640 = vst.msk [vmem:[%s2274_s2 + $0x498] sm:$0x3f] %vm493_vm1, %v478_v60  ;;  %v481_v5 = vadd.f32 %v321_v3, %v161_v2  ;;  %v482_v9 = vadd.f32 %v322_v6, %v162_v4 }
 0x34d   :  { %v163_v7 = vld [vmem:[%s2272_s0 + $0x4c0] sm:$0xff] }
 0x34e   :  { %641 = vst.msk [vmem:[%s2274_s2 + $0x4a0] sm:$0xff] %vm491_vm0, %v479_v0  ;;  %v483_v10 = vadd.f32 %v323_v8, %v163_v7 }
 0x34f   :  { %642 = vst.msk [vmem:[%s2274_s2 + $0x4a8] sm:$0x3f] %vm493_vm1, %v480_v1 }
 0x356   :  { %v164_v11 = vld [vmem:[%s2272_s0 + $0x4c8] sm:$0x3f]  ;;  %v165_v13 = vld [vmem:[%s2272_s0 + $0x4d0] sm:$0xff] }
 0x357   :  { %643 = vst.msk [vmem:[%s2274_s2 + $0x4b0] sm:$0xff] %vm491_vm0, %v481_v5  ;;  %v484_v14 = vadd.f32 %v324_v12, %v164_v11  ;;  %v485_v18 = vadd.f32 %v325_v15, %v165_v13 }
 0x35e   :  { %v166_v16 = vld [vmem:[%s2272_s0 + $0x4d8] sm:$0x3f] }
 0x35f   :  { %644 = vst.msk [vmem:[%s2274_s2 + $0x4b8] sm:$0x3f] %vm493_vm1, %v482_v9  ;;  %v486_v19 = vadd.f32 %v326_v17, %v166_v16 }
 0x360   :  { %645 = vst.msk [vmem:[%s2274_s2 + $0x4c0] sm:$0xff] %vm491_vm0, %v483_v10 }
 0x367   :  { %v167_v20 = vld [vmem:[%s2272_s0 + $0x4e0] sm:$0xff]  ;;  %v168_v22 = vld [vmem:[%s2272_s0 + $0x4e8] sm:$0x3f] }
 0x368   :  { %646 = vst.msk [vmem:[%s2274_s2 + $0x4c8] sm:$0x3f] %vm493_vm1, %v484_v14  ;;  %v487_v23 = vadd.f32 %v327_v21, %v167_v20  ;;  %v488_v27 = vadd.f32 %v328_v24, %v168_v22 }
 0x36f   :  { %v169_v25 = vld [vmem:[%s2272_s0 + $0x4f0] sm:$0xff] }
 0x370   :  { %647 = vst.msk [vmem:[%s2274_s2 + $0x4d0] sm:$0xff] %vm491_vm0, %v485_v18  ;;  %v489_v28 = vadd.f32 %v329_v26, %v169_v25 }
 0x371   :  { %648 = vst.msk [vmem:[%s2274_s2 + $0x4d8] sm:$0x3f] %vm493_vm1, %v486_v19 }
 0x378   :  { %v170_v29 = vld [vmem:[%s2272_s0 + $0x4f8] sm:$0x3f] }
 0x379   :  { %649 = vst.msk [vmem:[%s2274_s2 + $0x4e0] sm:$0xff] %vm491_vm0, %v487_v23  ;;  %v490_v31 = vadd.f32 %v330_v30, %v170_v29  ;;  %651 = vst.msk [vmem:[%s2274_s2 + $0x4f0] sm:$0xff] %vm491_vm0, %v489_v28 }
 0x37a   :  { %650 = vst.msk [vmem:[%s2274_s2 + $0x4e8] sm:$0x3f] %vm493_vm1, %v488_v27 }
 0x37b   :  { %652 = vst.msk [vmem:[%s2274_s2 + $0x4f8] sm:$0x3f] %vm493_vm1, %v490_v31 }

</bundles_post_ra>
